<compile_context>
chip_gen: v6e
topology: v6e:2x2x1
jax: 0.10.0
libtpu: 0.0.40
codegen_flags: <defaults>
</compile_context>

<pallas_src>
import math
from functools import partial

import jax
import jax.numpy as jnp
import numpy as np
from jax import lax
from jax.experimental import pallas as pl
from jax.experimental.pallas import tpu as pltpu

LN_EPS = 1e-5
_VMEM_LIMIT = 48 * 1024 * 1024   # safe on v5e/v6e (128 MiB) and v7x (64 MiB)


def _layernorm(v, w, b):
    mu = jnp.mean(v, axis=-1, keepdims=True)
    var = jnp.mean((v - mu) ** 2, axis=-1, keepdims=True)
    return (v - mu) * lax.rsqrt(var + LN_EPS) * w + b


# --------------------------- kernel A: projections ---------------------------
def _proj_kernel(x_ref, lnw_ref, lnb_ref, wq_ref, wk_ref, wv_ref,
                 q_ref, k_ref, v_ref):
    h = _layernorm(x_ref[0].astype(jnp.float32), lnw_ref[...], lnb_ref[...])
    hm = h.astype(wq_ref.dtype)                       # bf16 (or f32) matmul input
    q_ref[0] = jnp.dot(hm, wq_ref[...],
                       preferred_element_type=jnp.float32).astype(q_ref.dtype)
    k_ref[0] = jnp.dot(hm, wk_ref[...],
                       preferred_element_type=jnp.float32).astype(k_ref.dtype)
    v_ref[0] = jnp.dot(hm, wv_ref[...],
                       preferred_element_type=jnp.float32).astype(v_ref.dtype)


# ---------------- kernel B: fused-head flash attention + to_out --------------
def _attn_kernel(heads, dim_head, tq, tk, causal, approx_recip,
                 q_ref, k_ref, v_ref, wo_ref, olnw_ref, olnb_ref,
                 o_ref, m_sc, l_sc, acc_sc):
    qi = pl.program_id(1)
    ki = pl.program_id(2)
    rows = tq * heads
    neg_big = -jnp.finfo(jnp.float32).max

    @pl.when(ki == 0)
    def _init():
        m_sc[...] = jnp.full_like(m_sc, -jnp.inf)
        l_sc[...] = jnp.zeros_like(l_sc)
        acc_sc[...] = jnp.zeros_like(acc_sc)

    def _update():
        # All heads in one MXU call: view (TQ, H*D) as (TQ*H, D) rows against
        # the shared single-head K (row t*H + h == query t, head h).
        q2 = q_ref[0].reshape(rows, dim_head)
        s = lax.dot_general(q2, k_ref[0], (((1,), (1,)), ((), ())),
                            preferred_element_type=jnp.float32)   # (TQ*H, TK)
        if causal:
            qpos = qi * tq + lax.broadcasted_iota(jnp.int32, (rows, tk), 0) // heads
            kpos = ki * tk + lax.broadcasted_iota(jnp.int32, (rows, tk), 1)
            s = jnp.where(kpos > qpos, neg_big, s)
        m_prev = m_sc[...]
        m_new = jnp.maximum(m_prev, jnp.max(s, axis=-1, keepdims=True))
        alpha = jnp.exp(m_prev - m_new)
        p = jnp.exp(s - m_new)
        l_sc[...] = alpha * l_sc[...] + jnp.sum(p, axis=-1, keepdims=True)
        acc_sc[...] = alpha * acc_sc[...] + jnp.dot(
            p.astype(v_ref.dtype), v_ref[0], preferred_element_type=jnp.float32)
        m_sc[...] = m_new

    if causal:
        # Skip kv tiles that lie entirely above the causal diagonal.
        pl.when(ki * tk <= qi * tq + (tq - 1))(_update)
    else:
        _update()

    @pl.when(ki == pl.num_programs(2) - 1)
    def _finalize():
        inv_l = pl.reciprocal(l_sc[...], approx=approx_recip)      # EUP slot
        ctx = (acc_sc[...] * inv_l).reshape(tq, heads * dim_head)  # concat heads
        o = jnp.dot(ctx.astype(wo_ref.dtype), wo_ref[...],
                    preferred_element_type=jnp.float32)            # (TQ, W)
        o = _layernorm(o, olnw_ref[...], olnb_ref[...])            # to_out LN
        o_ref[0] = o.astype(o_ref.dtype)


# ----------------------------------- wrapper ---------------------------------
def _seq_tile(n, pref=128):
    """Use a 128-row tile when it divides the sequence, else the full axis."""
    return pref if n % pref == 0 else n


def _resident_spec(shape):
    """Weight BlockSpec: constant block index -> fetched once, stays resident."""
    zeros = (0,) * len(shape)
    return pl.BlockSpec(shape, lambda *_: zeros)


def causal_multi_head_attention(x, params, heads, dim_head, causal,
                                *, matmul_dtype=jnp.bfloat16):
    B, N, W = x.shape
    D = dim_head
    HD = heads * dim_head
    scale = D ** (-0.5)
    mm = np.dtype(matmul_dtype)
    approx_recip = (mm != np.dtype(np.float32))

    # Constant-fold the attention scaling into the projection weights and split
    # the fused to_kv weight so kernels never slice the lane dimension.
    wq = (params["wq"] * (scale * math.sqrt(scale))).astype(mm)
    wk = (params["wkv"][:, :D] * math.sqrt(scale)).astype(mm)
    wv = params["wkv"][:, D:].astype(mm)
    wo = params["wo"].astype(mm)
    ln_w, ln_b = params["ln_w"], params["ln_b"]
    oln_w, oln_b = params["out_ln_w"], params["out_ln_b"]

    TS = _seq_tile(N)     # projection seq tile
    TQ = _seq_tile(N)     # query tile
    TK = _seq_tile(N)     # key/value tile

    # ------------------ kernel A: LayerNorm + q/k/v projections --------------
    q, k, v = pl.pallas_call(
        _proj_kernel,
        out_shape=(jax.ShapeDtypeStruct((B, N, HD), mm),
                   jax.ShapeDtypeStruct((B, N, D), mm),
                   jax.ShapeDtypeStruct((B, N, D), mm)),
        grid_spec=pltpu.PrefetchScalarGridSpec(
            num_scalar_prefetch=0,
            grid=(B, N // TS),
            in_specs=[
                pl.BlockSpec((1, TS, W), lambda b, s: (b, s, 0)),
                _resident_spec((1, W)), _resident_spec((1, W)),
                _resident_spec((W, HD)), _resident_spec((W, D)),
                _resident_spec((W, D)),
            ],
            out_specs=[
                pl.BlockSpec((1, TS, HD), lambda b, s: (b, s, 0)),
                pl.BlockSpec((1, TS, D), lambda b, s: (b, s, 0)),
                pl.BlockSpec((1, TS, D), lambda b, s: (b, s, 0)),
            ],
        ),
        compiler_params=pltpu.CompilerParams(
            dimension_semantics=("parallel", "parallel"),
            vmem_limit_bytes=_VMEM_LIMIT),
    )(x, ln_w, ln_b, wq, wk, wv)

    # ------------- kernel B: fused-head flash attention + to_out -------------
    kernel = partial(_attn_kernel, heads, D, TQ, TK, causal, approx_recip)
    out = pl.pallas_call(
        kernel,
        out_shape=jax.ShapeDtypeStruct((B, N, W), x.dtype),
        grid_spec=pltpu.PrefetchScalarGridSpec(
            num_scalar_prefetch=0,
            grid=(B, N // TQ, N // TK),
            in_specs=[
                pl.BlockSpec((1, TQ, HD), lambda b, qi, ki: (b, qi, 0)),
                pl.BlockSpec((1, TK, D), lambda b, qi, ki: (b, ki, 0)),
                pl.BlockSpec((1, TK, D), lambda b, qi, ki: (b, ki, 0)),
                _resident_spec((HD, W)),
                _resident_spec((1, W)),
                _resident_spec((1, W)),
            ],
            out_specs=pl.BlockSpec((1, TQ, W), lambda b, qi, ki: (b, qi, 0)),
            scratch_shapes=[
                pltpu.VMEM((TQ * heads, 1), jnp.float32),   # running max
                pltpu.VMEM((TQ * heads, 1), jnp.float32),   # running denom
                pltpu.VMEM((TQ * heads, D), jnp.float32),   # running context
            ],
        ),
        compiler_params=pltpu.CompilerParams(
            dimension_semantics=("parallel", "parallel", "arbitrary"),
            vmem_limit_bytes=_VMEM_LIMIT),
    )(q, k, v, wo, oln_w, oln_b)
    return out


# --------------------------------- test utils --------------------------------
def init_params(key, width, heads, dim_head):
    inner = heads * dim_head
    ks = jax.random.split(key, 8)

    def lin_t(k, fan_in, fan_out):
        # torch Linear weight (out,in) init, pre-transposed to (in,out)
        bound = 1.0 / math.sqrt(fan_in)
        return jax.random.uniform(k, (fan_in, fan_out), jnp.float32, -bound, bound)

    def vec(k, n, base):
        return base + 0.05 * jax.random.normal(k, (1, n), jnp.float32)

    return dict(
        ln_w=vec(ks[0], width, 1.0), ln_b=vec(ks[1], width, 0.0),
        wq=lin_t(ks[2], width, inner),            # to_q (no bias)
        wkv=lin_t(ks[3], width, 2 * dim_head),    # to_kv (no bias)
        wo=lin_t(ks[4], inner, width),            # to_out[0] (no bias)
        out_ln_w=vec(ks[5], width, 1.0), out_ln_b=vec(ks[6], width, 0.0),
    )


def reference(x, p, heads, dim_head, causal):
    """Pure-JAX reference mirroring the PyTorch forward (mask=None)."""
    def ln(v, w, b):
        mu = v.mean(-1, keepdims=True)
        var = ((v - mu) ** 2).mean(-1, keepdims=True)
        return (v - mu) / jnp.sqrt(var + LN_EPS) * w + b

    B, N, _ = x.shape
    d = dim_head
    scale = d ** (-0.5)
    h = ln(x, p["ln_w"], p["ln_b"])
    q = h @ p["wq"]
    kv = h @ p["wkv"]
    k, v = kv[..., :d], kv[..., d:]
    q = q.reshape(B, N, heads, d).transpose(0, 2, 1, 3)   # b h n d
    q = q * scale
    q = q * math.sqrt(scale)
    k = k * math.sqrt(scale)
    sim = jnp.einsum("bhid,bjd->bhij", q, k)
    if causal:
        cm = jnp.triu(jnp.ones((N, N), bool), 1)
        sim = jnp.where(cm, -jnp.finfo(jnp.float32).max, sim)
    attn = jax.nn.softmax(sim.astype(jnp.float32), axis=-1)
    out = jnp.einsum("bhij,bjd->bhid", attn, v)
    out = out.transpose(0, 2, 1, 3).reshape(B, N, heads * d)
    out = out @ p["wo"]
    return ln(out, p["out_ln_w"], p["out_ln_b"])


if __name__ == "__main__":
    # ---- test 1: tiny shape (single tile per grid axis) ----
    B, N, W = 2, 8, 32
    heads, dim_head = 4, 8
    causal = True
    kx, kp = jax.random.split(jax.random.PRNGKey(0))
    x = jax.random.normal(kx, (B, N, W), jnp.float32)
    params = init_params(kp, W, heads, dim_head)
    y_ref = reference(x, params, heads, dim_head, causal)

    y32 = causal_multi_head_attention(x, params, heads, dim_head, causal,
                                      matmul_dtype=jnp.float32)
    jax.block_until_ready(y32)
    np.testing.assert_allclose(np.asarray(y32), np.asarray(y_ref),
                               rtol=1e-4, atol=1e-4)

    ybf = causal_multi_head_attention(x, params, heads, dim_head, causal,
                                      matmul_dtype=jnp.bfloat16)
    jax.block_until_ready(ybf)
    np.testing.assert_allclose(np.asarray(ybf), np.asarray(y_ref),
                               rtol=1e-1, atol=1e-1)   # bf16 matmuls, f32 accum

    # ---- test 2: multi-tile path (online softmax across kv tiles, causal skip)
    B2, N2, W2 = 1, 256, 64
    h2, d2 = 4, 16
    kx2, kp2 = jax.random.split(jax.random.PRNGKey(1))
    x2 = jax.random.normal(kx2, (B2, N2, W2), jnp.float32)
    p2 = init_params(kp2, W2, h2, d2)
    y2 = causal_multi_head_attention(x2, p2, h2, d2, True,
                                     matmul_dtype=jnp.float32)
    jax.block_until_ready(y2)
    y2_ref = reference(x2, p2, h2, d2, True)
    np.testing.assert_allclose(np.asarray(y2), np.asarray(y2_ref),
                               rtol=1e-4, atol=1e-4)

    print("KERNEL_OK")
</pallas_src>

<mosaic_0001>
module attributes {stable_mosaic.version = 11 : i64} {
  func.func @_proj_kernel(%arg0: i32, %arg1: i32, %arg2: memref<1x8x32xf32, #tpu.memory_space<vmem>>, %arg3: memref<1x32xf32, #tpu.memory_space<vmem>>, %arg4: memref<1x32xf32, #tpu.memory_space<vmem>>, %arg5: memref<32x32xf32, #tpu.memory_space<vmem>>, %arg6: memref<32x8xf32, #tpu.memory_space<vmem>>, %arg7: memref<32x8xf32, #tpu.memory_space<vmem>>, %arg8: memref<1x8x32xf32, #tpu.memory_space<vmem>>, %arg9: memref<1x8x8xf32, #tpu.memory_space<vmem>>, %arg10: memref<1x8x8xf32, #tpu.memory_space<vmem>>) attributes {dimension_semantics = [#tpu.dimension_semantics<parallel>, #tpu.dimension_semantics<parallel>], iteration_bounds = array<i64: 2, 1>, scalar_prefetch = 0 : i64, scratch_operands = 0 : i64, tpu.core_type = #tpu.core_type<tc>, window_params = [{transform_indices = @transform_0, window_bounds = array<i64: 1, 8, 32>}, {pipeline_mode = #tpu.pipeline_mode<synchronous>, transform_indices = @transform_1, window_bounds = array<i64: 1, 32>}, {pipeline_mode = #tpu.pipeline_mode<synchronous>, transform_indices = @transform_2, window_bounds = array<i64: 1, 32>}, {pipeline_mode = #tpu.pipeline_mode<synchronous>, transform_indices = @transform_3, window_bounds = array<i64: 32, 32>}, {pipeline_mode = #tpu.pipeline_mode<synchronous>, transform_indices = @transform_4, window_bounds = array<i64: 32, 8>}, {pipeline_mode = #tpu.pipeline_mode<synchronous>, transform_indices = @transform_5, window_bounds = array<i64: 32, 8>}, {transform_indices = @transform_6, window_bounds = array<i64: 1, 8, 32>}, {transform_indices = @transform_7, window_bounds = array<i64: 1, 8, 8>}, {transform_indices = @transform_8, window_bounds = array<i64: 1, 8, 8>}]} {
    %c0 = arith.constant 0 : index
    %c0_0 = arith.constant 0 : index
    %c0_1 = arith.constant 0 : index
    %0 = vector.load %arg2[%c0, %c0_0, %c0_1] : memref<1x8x32xf32, #tpu.memory_space<vmem>>, vector<1x8x32xf32>
    %1 = vector.shape_cast %0 : vector<1x8x32xf32> to vector<8x32xf32>
    %c0_2 = arith.constant 0 : index
    %c0_3 = arith.constant 0 : index
    %2 = vector.load %arg3[%c0_2, %c0_3] : memref<1x32xf32, #tpu.memory_space<vmem>>, vector<1x32xf32>
    %c0_4 = arith.constant 0 : index
    %c0_5 = arith.constant 0 : index
    %3 = vector.load %arg4[%c0_4, %c0_5] : memref<1x32xf32, #tpu.memory_space<vmem>>, vector<1x32xf32>
    %cst = arith.constant dense<0.000000e+00> : vector<8xf32>
    %4 = vector.multi_reduction <add>, %1, %cst [1] : vector<8x32xf32> to vector<8xf32>
    %5 = vector.shape_cast %4 : vector<8xf32> to vector<8x1xf32>
    %cst_6 = arith.constant 3.200000e+01 : f32
    %6 = vector.broadcast %cst_6 : f32 to vector<8x1xf32>
    %7 = arith.divf %5, %6 : vector<8x1xf32>
    %8 = vector.broadcast %7 : vector<8x1xf32> to vector<8x32xf32>
    %9 = arith.subf %1, %8 : vector<8x32xf32>
    %10 = arith.mulf %9, %9 : vector<8x32xf32>
    %cst_7 = arith.constant dense<0.000000e+00> : vector<8xf32>
    %11 = vector.multi_reduction <add>, %10, %cst_7 [1] : vector<8x32xf32> to vector<8xf32>
    %12 = vector.shape_cast %11 : vector<8xf32> to vector<8x1xf32>
    %cst_8 = arith.constant 3.200000e+01 : f32
    %13 = vector.broadcast %cst_8 : f32 to vector<8x1xf32>
    %14 = arith.divf %12, %13 : vector<8x1xf32>
    %15 = vector.broadcast %7 : vector<8x1xf32> to vector<8x32xf32>
    %16 = arith.subf %1, %15 : vector<8x32xf32>
    %cst_9 = arith.constant 9.99999974E-6 : f32
    %17 = vector.broadcast %cst_9 : f32 to vector<8x1xf32>
    %18 = arith.addf %14, %17 : vector<8x1xf32>
    %19 = math.rsqrt %18 : vector<8x1xf32>
    %20 = vector.broadcast %19 : vector<8x1xf32> to vector<8x32xf32>
    %21 = arith.mulf %16, %20 : vector<8x32xf32>
    %22 = vector.broadcast %2 : vector<1x32xf32> to vector<8x32xf32>
    %23 = arith.mulf %21, %22 : vector<8x32xf32>
    %24 = vector.broadcast %3 : vector<1x32xf32> to vector<8x32xf32>
    %25 = arith.addf %23, %24 : vector<8x32xf32>
    %c0_10 = arith.constant 0 : index
    %c0_11 = arith.constant 0 : index
    %26 = vector.load %arg5[%c0_10, %c0_11] : memref<32x32xf32, #tpu.memory_space<vmem>>, vector<32x32xf32>
    %cst_12 = arith.constant dense<0.000000e+00> : vector<8x32xf32>
    %27 = tpu.matmul %25, %26, %cst_12 {dimension_numbers = #tpu.dot_dimension_numbers<[1], [0], [0], [1], [0, 0, 1, 1], [], []>} : vector<8x32xf32>, vector<32x32xf32>, vector<8x32xf32> -> vector<8x32xf32>
    %c0_13 = arith.constant 0 : index
    %c0_14 = arith.constant 0 : index
    %c0_15 = arith.constant 0 : index
    %28 = vector.load %arg8[%c0_13, %c0_14, %c0_15] : memref<1x8x32xf32, #tpu.memory_space<vmem>>, vector<1x8x32xf32>
    %29 = vector.shape_cast %28 : vector<1x8x32xf32> to vector<8x32xf32>
    %30 = vector.shape_cast %27 : vector<8x32xf32> to vector<1x8x32xf32>
    tpu.vector_store %arg8[%c0_13, %c0_14, %c0_15], %30 {strides = array<i32>} : memref<1x8x32xf32, #tpu.memory_space<vmem>>, vector<1x8x32xf32>,
    %c0_16 = arith.constant 0 : index
    %c0_17 = arith.constant 0 : index
    %31 = vector.load %arg6[%c0_16, %c0_17] : memref<32x8xf32, #tpu.memory_space<vmem>>, vector<32x8xf32>
    %cst_18 = arith.constant dense<0.000000e+00> : vector<8x8xf32>
    %32 = tpu.matmul %25, %31, %cst_18 {dimension_numbers = #tpu.dot_dimension_numbers<[1], [0], [0], [1], [0, 0, 1, 1], [], []>} : vector<8x32xf32>, vector<32x8xf32>, vector<8x8xf32> -> vector<8x8xf32>
    %c0_19 = arith.constant 0 : index
    %c0_20 = arith.constant 0 : index
    %c0_21 = arith.constant 0 : index
    %33 = vector.load %arg9[%c0_19, %c0_20, %c0_21] : memref<1x8x8xf32, #tpu.memory_space<vmem>>, vector<1x8x8xf32>
    %34 = vector.shape_cast %33 : vector<1x8x8xf32> to vector<8x8xf32>
    %35 = vector.shape_cast %32 : vector<8x8xf32> to vector<1x8x8xf32>
    tpu.vector_store %arg9[%c0_19, %c0_20, %c0_21], %35 {strides = array<i32>} : memref<1x8x8xf32, #tpu.memory_space<vmem>>, vector<1x8x8xf32>,
    %c0_22 = arith.constant 0 : index
    %c0_23 = arith.constant 0 : index
    %36 = vector.load %arg7[%c0_22, %c0_23] : memref<32x8xf32, #tpu.memory_space<vmem>>, vector<32x8xf32>
    %cst_24 = arith.constant dense<0.000000e+00> : vector<8x8xf32>
    %37 = tpu.matmul %25, %36, %cst_24 {dimension_numbers = #tpu.dot_dimension_numbers<[1], [0], [0], [1], [0, 0, 1, 1], [], []>} : vector<8x32xf32>, vector<32x8xf32>, vector<8x8xf32> -> vector<8x8xf32>
    %c0_25 = arith.constant 0 : index
    %c0_26 = arith.constant 0 : index
    %c0_27 = arith.constant 0 : index
    %38 = vector.load %arg10[%c0_25, %c0_26, %c0_27] : memref<1x8x8xf32, #tpu.memory_space<vmem>>, vector<1x8x8xf32>
    %39 = vector.shape_cast %38 : vector<1x8x8xf32> to vector<8x8xf32>
    %40 = vector.shape_cast %37 : vector<8x8xf32> to vector<1x8x8xf32>
    tpu.vector_store %arg10[%c0_25, %c0_26, %c0_27], %40 {strides = array<i32>} : memref<1x8x8xf32, #tpu.memory_space<vmem>>, vector<1x8x8xf32>,
    return
  }
  func.func @transform_0(%arg0: i32, %arg1: i32) -> (i32, i32, i32) {
    %c0_i32 = arith.constant 0 : i32
    %c0_i32_0 = arith.constant 0 : i32
    return %arg0, %arg1, %c0_i32 : i32, i32, i32
  }
  func.func @transform_1(%arg0: i32, %arg1: i32) -> (i32, i32) {
    %c0_i32 = arith.constant 0 : i32
    %c0_i32_0 = arith.constant 0 : i32
    %c0_i32_1 = arith.constant 0 : i32
    return %c0_i32, %c0_i32_0 : i32, i32
  }
  func.func @transform_2(%arg0: i32, %arg1: i32) -> (i32, i32) {
    %c0_i32 = arith.constant 0 : i32
    %c0_i32_0 = arith.constant 0 : i32
    %c0_i32_1 = arith.constant 0 : i32
    return %c0_i32, %c0_i32_0 : i32, i32
  }
  func.func @transform_3(%arg0: i32, %arg1: i32) -> (i32, i32) {
    %c0_i32 = arith.constant 0 : i32
    %c0_i32_0 = arith.constant 0 : i32
    %c0_i32_1 = arith.constant 0 : i32
    return %c0_i32, %c0_i32_0 : i32, i32
  }
  func.func @transform_4(%arg0: i32, %arg1: i32) -> (i32, i32) {
    %c0_i32 = arith.constant 0 : i32
    %c0_i32_0 = arith.constant 0 : i32
    %c0_i32_1 = arith.constant 0 : i32
    return %c0_i32, %c0_i32_0 : i32, i32
  }
  func.func @transform_5(%arg0: i32, %arg1: i32) -> (i32, i32) {
    %c0_i32 = arith.constant 0 : i32
    %c0_i32_0 = arith.constant 0 : i32
    %c0_i32_1 = arith.constant 0 : i32
    return %c0_i32, %c0_i32_0 : i32, i32
  }
  func.func @transform_6(%arg0: i32, %arg1: i32) -> (i32, i32, i32) {
    %c0_i32 = arith.constant 0 : i32
    %c0_i32_0 = arith.constant 0 : i32
    return %arg0, %arg1, %c0_i32 : i32, i32, i32
  }
  func.func @transform_7(%arg0: i32, %arg1: i32) -> (i32, i32, i32) {
    %c0_i32 = arith.constant 0 : i32
    %c0_i32_0 = arith.constant 0 : i32
    return %arg0, %arg1, %c0_i32 : i32, i32, i32
  }
  func.func @transform_8(%arg0: i32, %arg1: i32) -> (i32, i32, i32) {
    %c0_i32 = arith.constant 0 : i32
    %c0_i32_0 = arith.constant 0 : i32
    return %arg0, %arg1, %c0_i32 : i32, i32, i32
  }
}

</mosaic_0001>

<bundles_post_ra>
// kernel: tpu_custom_call.1
= control target key start
LH: loop header
LB: loop body
LE: loop exit
PB: predicated region body
PF: predicated region fallthrough
CT: control target
= control target key end

     0   :  { %s1360_s0 = inlined_call_operand.vmem [shape: f32[2,8,32], index: 0, kind: input, shape index: {}]   ;;  %s1361_s1 = inlined_call_operand.vmem [shape: f32[1,32], index: 1, kind: input, shape index: {}]   ;;  %s1362_s2 = inlined_call_operand.vmem [shape: f32[1,32], index: 2, kind: input, shape index: {}]   ;;  %s1363_s3 = inlined_call_operand.vmem [shape: f32[32,32], index: 3, kind: input, shape index: {}]   ;;  %s1364_s4 = inlined_call_operand.vmem [shape: f32[32,8], index: 4, kind: input, shape index: {}]   ;;  %s1365_s5 = inlined_call_operand.vmem [shape: f32[32,8], index: 5, kind: input, shape index: {}]   ;;  %s1366_s6 = inlined_call_operand.hbm [shape: f32[2,8,32], index: 6, kind: output, shape index: {0}]   ;;  %s1367_s7 = inlined_call_operand.hbm [shape: f32[2,8,8], index: 7, kind: output, shape index: {1}]   ;;  %s1368_s8 = inlined_call_operand.hbm [shape: f32[2,8,8], index: 8, kind: output, shape index: {2}]  }
   0x1   :  { %1371 = sst [smem:[#allocation9_spill]] %s1360_s0 }
   0x2   :  { %1372 = sst [smem:[#allocation10_spill]] %s1361_s1 }
   0x3   :  { %1373 = sst [smem:[#allocation11_spill]] %s1362_s2 }
   0x4   :  { %14 = vsyncpa [#allocation3], 0 }
   0x5   :  { %16 = vsyncpa [#allocation3 + $0x1], 0 }
   0x6   :  { %17 = vsyncpa [#allocation5], 0 }
   0x7   :  { %19 = vsyncpa [#allocation5 + $0x1], 0  ;;  %s1119_s27 = smov 0   ;;  %s1121_s28 = smov 0  }
   0x8   :  { %s1123_s29 = smov 0   ;;  %s1125_s30 = smov 0  }
   0x9   :  { %s1127_s9 = smov 0   ;;  %s1129_s10 = smov 0  }
   0xa LB: > { %s796_s11 = sadd.s32 4294967295, %s1067_s10   ;;  %s1369_s12 = sadd.s32 4294967294, %s1067_s10   ;;  %s1067_s10 = sphi %s1129_s10, %s25_s10   ;;  %s1063_s9 = sphi %s1127_s9, %s1387_s9   ;;  %s1059_s30 = sphi %s1125_s30, %s1386_s30   ;;  %s1055_s29 = sphi %s1123_s29, %s1385_s29   ;;  %s1051_s28 = sphi %s1121_s28, %s1384_s28   ;;  %s1047_s27 = sphi %s1119_s27, %s1383_s27  }
   0xb   : > { %s37_s13 = sadd.s32 1, %s1063_s9  ;;  %s179_s14 = sadd.s32 1, %s1055_s29 }
   0xc   : > { %p39_p0 = scmp.ge.s32.totalorder %s37_s13, 2  ;;  %p189_p1 = scmp.ne.s32.totalorder %s1055_s29, %s1051_s28 }
   0xd   : > { %p190_p2 = scmp.eq.s32.totalorder %s796_s11, 1  ;;  %p195_p3 = scmp.ne.s32.totalorder %s1051_s28, %s1047_s27 }
   0xe   : > { %s1389_s13 = smov (%p39_p0, %s37_s13), 0  ;;  %p196_p5 = scmp.eq.s32.totalorder %s1369_s12, 1 }
   0xf   : > { %p1161_p4 = por %p190_p2, %p189_p1  ;;  %s174_s16 = ssub.s32 %s1063_s9, %s1389_s13 }
  0x10   : > { %p800_p6 = scmp.ge.s32.totalorder %s1067_s10, 1  ;;  %p177_p7 = scmp.eq.s32.totalorder %s174_s16, 0 }
  0x11   : > { %p1170_p8 = por %p196_p5, %p195_p3  ;;  %p295_p9 = scmp.lt.s32.totalorder %s1067_s10, 3 }
  0x12   : > { %s1176_s18 = scalar_select %p177_p7, %s1055_s29, %s179_s14  }
  0x13   : > { %p296_p10 = pnand %p800_p6, %p295_p9 }
  0x14   : > { %p341_p11 = scmp.lt.s32.totalorder (!%p296_p10), %s1059_s30, 1  ;;  %s1376_s0 = sld [smem:[#allocation9_spill]] (!%p296_p10) }
  0x15   : > { %299 = sbr.rel (%p296_p10) target bundleno = 593 (0x251), region = 44  ;;  %s1377_s1 = sld [smem:[#allocation10_spill]] (!%p296_p10) }
  0x16   : > { %s1378_s2 = sld [smem:[#allocation11_spill]] (!%p296_p10)  ;;  %s1370_s22 = sand.u32 (!%p296_p10), 1, %s1051_s28  }
  0x17   : > { %s1240_s24 = sand.u32 (!%p296_p10), 1, %s796_s11   ;;  %s1243_s25 = sshll.u32 (!%p296_p10), %s1059_s30, 7 }
  0x18   : > { %s1251_s12 = scalar_lea.hbm (!%p296_p10), %s1367_s7, %s1243_s25 }
  0x1a   : > { %s342_s19 = scalar_select %p341_p11, %s1059_s30, 1  ;;  %vm351_vm0 = vcmask 261120   ;;  %v383_v7 = vld [vmem:[%s1363_s3 + $0x18] sm:$0xff]  ;;  %v1069_v9 = vmov 0.0   ;;  %v382_v10 = vld [vmem:[%s1363_s3 + $0x10] sm:$0xff]  ;;  %v381_v12 = vld [vmem:[%s1363_s3 + $0x8] sm:$0xff] }
  0x1b   : > { %v461_v8 = vld [vmem:[%s1364_s4 + $0x18] sm:$0xff]  ;;  %833 = vmatprep.subr.mxu0 %v1069_v9  ;;  %844 = vmatprep.subr.mxu1 %v1069_v9  ;;  %v460_v11 = vld [vmem:[%s1364_s4 + $0x10] sm:$0xff]  ;;  %v459_v13 = vld [vmem:[%s1364_s4 + $0x8] sm:$0xff]  ;;  %vm1070_vm1 = vmmov 0   ;;  %vm532_vm2 = vcmask 64512  }
  0x1c   : > { %s804_s20 = sshll.u32 %s342_s19, 3  ;;  %834 = vmatpush3.msra.mxu0 %v383_v7  ;;  %845 = vmatpush3.msra.mxu1 %v461_v8  ;;  %v380_v14 = vld [vmem:[%s1363_s3] sm:$0xff]  ;;  %v537_v25 = vld [vmem:[%s1365_s5 + $0x18] sm:$0xff]  ;;  %v536_v26 = vld [vmem:[%s1365_s5 + $0x10] sm:$0xff] }
  0x1d   : > { %s347_s23 = scalar_lea.vmem %s1376_s0, %s804_s20  ;;  %835 = vmatprep.subr.mxu0 %v1069_v9  ;;  %846 = vmatprep.subr.mxu1 %v1069_v9  ;;  %v458_v15 = vld [vmem:[%s1364_s4] sm:$0xff]  ;;  %v535_v27 = vld [vmem:[%s1365_s5 + $0x8] sm:$0xff]  ;;  %s1071_s0 = smov [#allocation4]  }
  0x1e   : > { %v348_v0 = vld [vmem:[%s347_s23] sm:$0xff]  ;;  %836 = vmatpush3.msra.mxu0 %v382_v10  ;;  %847 = vmatpush3.msra.mxu1 %v460_v11  ;;  %s1236_s23 = sshll.u32 %s1370_s22, 3  ;;  %s1259_s22 = scalar_lea.hbm %s1366_s6, %s1243_s25 }
  0x1f   : > { %v352_v1 = vsel %vm351_vm0, %v348_v0, 0.0  ;;  %837 = vmatprep.subr.mxu0 %v1069_v9  ;;  %848 = vmatprep.subr.mxu1 %v1069_v9  ;;  %v805_v20 = vld [vmem:[%s1377_s1] ss:$0 sm:$0xff]  ;;  %s333_s26 = scalar_lea.vmem [#allocation4], %s1236_s23  ;;  %s326_s16 = scalar_lea.vmem [#allocation2], %s1236_s23 }
  0x20   : > { %353 = vadd.xlane.f32.xlu0 %v352_v1  ;;  %838 = vmatpush3.msra.mxu0 %v381_v12  ;;  %v806_v22 = vld [vmem:[%s1378_s2] ss:$0 sm:$0xff]  ;;  %s648_s14 = sshll.u32 %s333_s26, 4  ;;  %s634_s19 = sshll.u32 %s326_s16, 4  ;;  %s1253_s14 = int_to_ptr.vmem [resolvable:$true] %s648_s14  ;;  %s1261_s19 = int_to_ptr.vmem [resolvable:$true] %s634_s19 }
  0x21   : > { %849 = vmatpush3.msra.mxu1 %v459_v13  ;;  %839 = vmatprep.subr.mxu0 %v1069_v9  ;;  %v534_v28 = vld [vmem:[%s1365_s5] sm:$0xff]  ;;  %s935_s21 = scalar_lea.vmem %s1253_s14, 128  ;;  %s939_s1 = sshll.u32 %s1071_s0, 4  ;;  %s940_s1 = int_to_ptr.vmem [resolvable:$false] %s939_s1 }
  0x22   : > { %850 = vmatprep.subr.mxu1 %v1069_v9  ;;  %840 = vmatpush3.msra.mxu0 %v380_v14  ;;  %p936_p12 = scmp.ne.s32.totalorder %s1253_s14, %s935_s21  ;;  %s941_s30 = scalar_lea.vmem %s940_s1, 256 }
  0x23   : > { %841 = vmatprep.mubr.msk.f32.mxu0 %vm1070_vm1, %v1069_v9  ;;  %851 = vmatpush3.msra.mxu1 %v458_v15  ;;  %p942_p1 = scmp.lt.s32.totalorder %s1253_s14, %s940_s1  ;;  %p943_p2 = scmp.lt.s32.totalorder %s941_s30, %s935_s21 }
  0x24   : > { %852 = vmatprep.mubr.msk.f32.mxu1 %vm1070_vm1, %v1069_v9  ;;  %855 = vmatprep.subr.mxu0 %v1069_v9  ;;  %p937_p13 = pnand %p936_p12, %p1161_p4 }
  0x25   : > { %p944_p3 = por %p943_p2, %p942_p1 }
  0x26   : > { %p938_p0 = pneg %p937_p13 }
  0x28   : > { %p945_p5 = pnand %p944_p3, %p938_p0 }
  0xa9   : > { %v354_v2 = vpop.xlane.xlu0 %353 }
  0xaa   : > { %v356_v3 = vmul.f32 0.03125, %v354_v2 }
  0xac   : > { %v357_v4 = vsub.f32 %v348_v0, %v356_v3 }
  0xae   : > { %v358_v5 = vmul.f32 %v357_v4, %v357_v4 }
  0xb0   : > { %v359_v6 = vsel %vm351_vm0, %v358_v5, 0.0 }
  0xb1   : > { %360 = vadd.xlane.f32.xlu0 %v359_v6 }
 0x13a   : > { %v361_v16 = vpop.xlane.xlu0 %360 }
 0x13b   : > { %v362_v17 = vmul.f32 0.03125, %v361_v16 }
 0x13d   : > { %v363_v18 = vadd.f32 1e-05, %v362_v17 }
 0x13f   : > { %933 = vrsqrt.f32 %v363_v18 }
 0x14c   : > { %v934_v19 = vpop.eup %933 }
 0x14d   : > { %v365_v21 = vmul.f32 %v934_v19, %v357_v4 }
 0x14f   : > { %v372_v23 = vmul.f32 %v805_v20, %v365_v21 }
 0x151   : > { %v379_v24 = vadd.f32 %v806_v22, %v372_v23 }
 0x153   : > { %842 = vmatmul.mubr.msk.f32.vlgmr.msra.gmra.mxu0 %vm351_vm0, %v379_v24  ;;  %853 = vmatmul.mubr.msk.f32.vlgmr.msra.gmra.mxu1 %vm351_vm0, %v379_v24 }
 0x154   : > { %856 = vmatpush3.msra.mxu0 %v537_v25  ;;  %863 = vmatprep.mubr.msk.f32.mxu0 %vm1070_vm1, %v1069_v9 }
 0x155   : > { %857 = vmatprep.subr.mxu0 %v1069_v9 }
 0x156   : > { %858 = vmatpush3.msra.mxu0 %v536_v26 }
 0x157   : > { %859 = vmatprep.subr.mxu0 %v1069_v9 }
 0x158   : > { %860 = vmatpush3.msra.mxu0 %v535_v27 }
 0x159   : > { %861 = vmatprep.subr.mxu0 %v1069_v9 }
 0x15a   : > { %862 = vmatpush3.msra.mxu0 %v534_v28 }
 0x15b   : > { %864 = vmatmul.mubr.msk.f32.vlgmr.msra.gmra.mxu0 %vm351_vm0, %v379_v24 }
 0x213   : > { %v453_v29 = vpop.f32.mrf.mxu0  ;;  %v528_v30 = vpop.f32.mrf.mxu1 }
 0x214   : > { %457 = vst.msk [vmem:[%s326_s16] sm:$0xff] %vm351_vm0, %v453_v29 }
 0x215   : > { %533 = vst.msk [vmem:[%s333_s26] sm:$0xff] %vm532_vm2, %v528_v30  ;;  %v843_v31 = vpop.f32.mrf.mxu0  ;;  %v854_v32 = vpop.f32.mrf.mxu1 }
 0x216   : > { %948 = shalt.err (!%p945_p5)
}
 0x217   : > { %s949_s26 = scalar_lea.hbm %s1251_s12, 128  ;;  %s953_s0 = scalar_lea.hbm %s1367_s7, 256 }
 0x218   : > { %p950_p6 = scmp.ne.s32.totalorder %s1251_s12, %s949_s26  ;;  %p954_p10 = scmp.lt.s32.totalorder %s1251_s12, %s1367_s7 }
 0x219   : > { %p955_p11 = scmp.lt.s32.totalorder %s953_s0, %s949_s26 }
 0x21a   : > { %p951_p7 = pnand %p950_p6, %p1161_p4 }
 0x21b   : > { %p956_p12 = por %p955_p11, %p954_p10 }
 0x21c   : > { %p952_p9 = pneg %p951_p7 }
 0x21e   : > { %p957_p13 = pnand %p956_p12, %p952_p9 }
 0x220   : > { %960 = shalt.err (!%p957_p13)
}
 0x221   : > { %s1379_s1 = scalar_lea.sflag [#allocation5], %s1240_s24  ;;  %s1380_s21 = sand.u32 1, %s1051_s28  }
 0x222   : > { %867 = dma.vmem_to_hbm [thread:$0]  (%p1161_p4), %s1253_s14, 128, %s1251_s12, %s1379_s1  }
 0x223   : > { %s610_s30 = scalar_lea.sflag [#allocation3], %s1380_s21  ;;  %s961_s2 = scalar_lea.vmem %s1261_s19, 128 }
 0x224   : > { %p962_p0 = scmp.ne.s32.totalorder %s1261_s19, %s961_s2  ;;  %s1072_s20 = smov [#allocation2]  }
 0x225   : > { %s965_s26 = sshll.u32 %s1072_s20, 4  ;;  %s966_s26 = int_to_ptr.vmem [resolvable:$false] %s965_s26 }
 0x226   : > { %p963_p1 = pnand %p962_p0, %p1161_p4  ;;  %s967_s16 = scalar_lea.vmem %s966_s26, 256 }
 0x227   : > { %p968_p3 = scmp.lt.s32.totalorder %s1261_s19, %s966_s26  ;;  %p969_p5 = scmp.lt.s32.totalorder %s967_s16, %s961_s2 }
 0x228   : > { %p964_p2 = pneg %p963_p1 }
 0x229   : > { %p970_p6 = por %p969_p5, %p968_p3 }
 0x22b   : > { %p971_p7 = pnand %p970_p6, %p964_p2 }
 0x22d   : > { %974 = shalt.err (!%p971_p7)
}
 0x22e   : > { %s975_s12 = scalar_lea.hbm %s1259_s22, 128  ;;  %s979_s0 = scalar_lea.hbm %s1366_s6, 256 }
 0x22f   : > { %p976_p9 = scmp.ne.s32.totalorder %s1259_s22, %s975_s12  ;;  %p980_p12 = scmp.lt.s32.totalorder %s1259_s22, %s1366_s6 }
 0x230   : > { %p981_p13 = scmp.lt.s32.totalorder %s979_s0, %s975_s12 }
 0x231   : > { %p977_p10 = pnand %p976_p9, %p1161_p4 }
 0x232   : > { %p982_p0 = por %p981_p13, %p980_p12 }
 0x233   : > { %p978_p11 = pneg %p977_p10 }
 0x235   : > { %p983_p1 = pnand %p982_p0, %p978_p11 }
 0x237   : > { %986 = shalt.err (!%p983_p1)
}
 0x238   : > { %866 = dma.vmem_to_hbm [thread:$0]  (%p1161_p4), %s1261_s19, 128, %s1259_s22, %s610_s30   ;;  %v604_v33 = vpop.f32.mrf.mxu0 }
 0x239   : > { %s340_s2 = scalar_lea.vmem [#allocation6], %s1236_s23  ;;  %s660_s12 = scalar_lea.hbm %s1368_s8, %s1243_s25 }
 0x23a   : > { %s662_s20 = sshll.u32 %s340_s2, 4  ;;  %608 = vst.msk [vmem:[%s340_s2] sm:$0xff] %vm532_vm2, %v604_v33  ;;  %v865_v34 = vpop.f32.mrf.mxu0  ;;  %s1073_s22 = smov [#allocation6]   ;;  %s1311_s20 = int_to_ptr.vmem [resolvable:$true] %s662_s20 }
 0x23b   : > { %s987_s14 = scalar_lea.vmem %s1311_s20, 128  ;;  %s991_s23 = sshll.u32 %s1073_s22, 4  ;;  %s992_s23 = int_to_ptr.vmem [resolvable:$false] %s991_s23 }
 0x23c   : > { %p988_p2 = scmp.ne.s32.totalorder %s1311_s20, %s987_s14  ;;  %s993_s19 = scalar_lea.vmem %s992_s23, 256 }
 0x23d   : > { %p994_p6 = scmp.lt.s32.totalorder %s1311_s20, %s992_s23  ;;  %p995_p7 = scmp.lt.s32.totalorder %s993_s19, %s987_s14 }
 0x23e   : > { %p989_p3 = pnand %p988_p2, %p1161_p4 }
 0x23f   : > { %p996_p9 = por %p995_p7, %p994_p6 }
 0x240   : > { %p990_p5 = pneg %p989_p3 }
 0x242   : > { %p997_p10 = pnand %p996_p9, %p990_p5 }
 0x244   : > { %1000 = shalt.err (!%p997_p10)
}
 0x245   : > { %s1001_s30 = scalar_lea.hbm %s660_s12, 128  ;;  %s1005_s0 = scalar_lea.hbm %s1368_s8, 256 }
 0x246   : > { %p1002_p11 = scmp.ne.s32.totalorder %s660_s12, %s1001_s30  ;;  %p1006_p0 = scmp.lt.s32.totalorder %s660_s12, %s1368_s8 }
 0x247   : > { %p1007_p1 = scmp.lt.s32.totalorder %s1005_s0, %s1001_s30 }
 0x248   : > { %p1003_p12 = pnand %p1002_p11, %p1161_p4 }
 0x249   : > { %p1008_p2 = por %p1007_p1, %p1006_p0 }
 0x24a   : > { %p1004_p13 = pneg %p1003_p12 }
 0x24c   : > { %p1009_p3 = pnand %p1008_p2, %p1004_p13 }
 0x24e   : > { %1012 = shalt.err (!%p1009_p3)
}
 0x24f   : > { %s1381_s2 = scalar_lea.sflag [#allocation5], %s1240_s24 }
 0x250   : > { %868 = dma.vmem_to_hbm [thread:$0]  (%p1161_p4), %s1311_s20, 128, %s660_s12, %s1381_s2  }
 0x251 PF: > { %p882_p5 = scmp.ge.s32.totalorder %s1067_s10, 2  ;;  %s674_s26 = sand.u32 1, %s1047_s27  }
 0x252   : > { %s675_s16 = scalar_lea.sflag [#allocation3], %s674_s26 }
 0x253   : > { %p873_p6 = pnand %p882_p5, %p1170_p8 }
 0x255   : > { %p874_p7 = pneg %p873_p6 }
 0x257   : > { %1038 = dma.done.wait (%p874_p7), %s675_s16, 128  }
 0x258   : > { %1040 = vsyncadd (%p874_p7), %s675_s16, 4294967168  ;;  %s1382_s14 = sadd.s32 4294967294, %s1067_s10  }
 0x259   : > { %s683_s22 = sand.u32 1, %s1382_s14  }
 0x25a   : > { %s684_s15 = scalar_lea.sflag [#allocation5], %s683_s22 }
 0x25b   : > { %1042 = dma.done.wait (%p874_p7), %s684_s15, 256  }
 0x25c   : > { %1044 = vsyncadd (%p874_p7), %s684_s15, 4294967040  ;;  %s25_s10 = sadd.s32 1, %s1067_s10   ;;  %s1383_s27 = smov %s1051_s28 }
 0x25d   : > { %p22_p4 = scmp.ge.s32.totalorder %s25_s10, 4   ;;  %s1384_s28 = smov %s1055_s29 }
 0x25e   : > { %s1385_s29 = smov %s1176_s18  ;;  %s1386_s30 = smov %s1063_s9 }
 0x25f   : > { %s1387_s9 = smov %s1389_s13  ;;  %24 = sbr.rel (!%p22_p4) target bundleno = 10 (0xa), region = 111 }
 0x264   :  { %698 = vsyncpa [#allocation3], 1 }
 0x265   :  { %700 = vsyncpa [#allocation3 + $0x1], 1 }
 0x266   :  { %701 = vsyncpa [#allocation5], 1 }
 0x267   :  { %703 = vsyncpa [#allocation5 + $0x1], 1 }

</bundles_post_ra>
